<compile_context>
chip_gen: v7x
topology: tpu7x:2x2x1
jax: 0.10.0
libtpu: 0.0.40
codegen_flags: <defaults>
</compile_context>

<pallas_src>
import jax
import jax.numpy as jnp
from jax.experimental import pallas as pl
from jax.experimental.pallas import tpu as pltpu


def _decoder_hsi_kernel(x_ref, w_ref, o_ref):
    # Single MXU pass per row tile: (tm, K) @ (K, 128) -> (tm, 128), all lanes
    # of the output useful (dense, unmasked stores).
    o_ref[...] = jnp.dot(
        x_ref[...], w_ref[...], preferred_element_type=jnp.float32
    ).astype(o_ref.dtype)


def decoder_hsi_forward(x, w1, w2, *, tile_rows=16384):
    """uSDN Decoder_Hsi forward: (x @ w1) @ w2.

    x: (N, num), w1: (num, num), w2: (num, dimlr2) -> (N, dimlr2)
    """
    N, num = x.shape
    assert w1.shape == (num, num), w1.shape
    num2, dimlr2 = w2.shape
    assert num2 == num, (num2, num)
    dtype = x.dtype
    itemsize = jnp.dtype(dtype).itemsize

    # ---- Fold the two tiny weights ONCE, outside the grid loop (plain XLA
    # dot: num*num*dimlr2 ~ 16K FLOPs, not worth an MXU push per grid step).
    w = jnp.dot(w1, w2, preferred_element_type=jnp.float32).astype(dtype)

    # ---- Block-diagonal lane-dense repack.
    # pack rows of x 8-at-a-time so the output last dim becomes a dense 128.
    pack = 128 // dimlr2 if (0 < dimlr2 <= 128 and 128 % dimlr2 == 0) else 1

    # Pad N so the reshaped row count is a multiple of 8 (full sublanes).
    row_quant = 8 * pack
    n_pad = pl.cdiv(N, row_quant) * row_quant
    if n_pad != N:
        x = jnp.pad(x, ((0, n_pad - N), (0, 0)))
    rows = n_pad // pack            # reshaped row count (multiple of 8)
    k_dim = num * pack              # e.g. 256
    n_dim = dimlr2 * pack           # e.g. 128

    x_r = x.reshape(rows, k_dim)    # free row-major view
    if pack > 1:
        # blockdiag(W, W, ..., W): (num*pack, dimlr2*pack)
        w_bd = jnp.kron(jnp.eye(pack, dtype=dtype), w)
    else:
        w_bd = w

    # ---- Row tiling: big tiles (amortize ~600-cycle per-step overhead), but
    # keep >=2 grid steps when there is enough work so the "parallel" axis can
    # shard across both v7x TensorCores.
    tm = max(8, min(tile_rows // pack, rows))
    if rows >= 16:
        tm = min(tm, max(8, rows // 2))
    tm = max(8, (tm // 8) * 8)      # sublane-aligned (rows % tm stays 8-aligned)
    grid = (pl.cdiv(rows, tm),)

    flops = 2 * rows * k_dim * n_dim
    bytes_accessed = (rows * k_dim + k_dim * n_dim + rows * n_dim) * itemsize

    out_r = pl.pallas_call(
        _decoder_hsi_kernel,
        out_shape=jax.ShapeDtypeStruct((rows, n_dim), dtype),
        grid_spec=pltpu.PrefetchScalarGridSpec(
            num_scalar_prefetch=0,
            grid=grid,
            in_specs=[
                pl.BlockSpec((tm, k_dim), lambda i: (i, 0)),      # row tile of x
                pl.BlockSpec((k_dim, n_dim), lambda i: (0, 0)),   # resident W_bd
            ],
            out_specs=pl.BlockSpec((tm, n_dim), lambda i: (i, 0)),
        ),
        compiler_params=pltpu.CompilerParams(
            dimension_semantics=("parallel",),
        ),
        cost_estimate=pl.CostEstimate(
            flops=flops, transcendentals=0, bytes_accessed=bytes_accessed
        ),
    )(x_r, w_bd)

    out = out_r.reshape(n_pad, dimlr2)   # free view back to (N_pad, dimlr2)
    if n_pad != N:
        out = out[:N]
    return out


def decoder_op(w1, w2):
    """Decoder_Hsi.decoder_op(): w1 @ w2 (tiny 32x32x16 product; a plain XLA
    dot is strictly better than a Pallas launch for this)."""
    return jnp.dot(w1, w2, preferred_element_type=w1.dtype)


if __name__ == "__main__":
    # Module-consistent small shapes:
    #   num = 32 abundance dim, dimlr = (h, w, 16) -> dimlr[2] = 16 LR bands,
    #   N = 4096 flattened LR-HSI pixels (64x64).
    num = 32
    dimlr2 = 16
    N = 4096

    key = jax.random.PRNGKey(0)
    kx, k1, k2 = jax.random.split(key, 3)

    x = jax.random.normal(kx, (N, num), dtype=jnp.float32)
    # torch.normal(0, 0.1, size=...) equivalent init.
    lr_decoder_w1 = 0.1 * jax.random.normal(k1, (num, num), dtype=jnp.float32)
    lr_decoder_w2 = 0.1 * jax.random.normal(k2, (num, dimlr2), dtype=jnp.float32)

    out = decoder_hsi_forward(x, lr_decoder_w1, lr_decoder_w2)
    out = jax.block_until_ready(out)

    # Pure-JAX reference of the original (x @ w1) @ w2 semantics.  The folded
    # (and block-diagonal-repacked) kernel differs only by fp32 re-association.
    ref = (x @ lr_decoder_w1) @ lr_decoder_w2
    assert out.shape == (N, dimlr2), out.shape
    assert jnp.allclose(out, ref, atol=1e-4, rtol=1e-4), float(
        jnp.max(jnp.abs(out - ref))
    )

    dop = jax.block_until_ready(decoder_op(lr_decoder_w1, lr_decoder_w2))
    assert jnp.allclose(dop, lr_decoder_w1 @ lr_decoder_w2, atol=1e-5, rtol=1e-5)

    print("KERNEL_OK")
</pallas_src>

<mosaic_0001>
module attributes {stable_mosaic.version = 11 : i64} {
  func.func @_decoder_hsi_kernel(%arg0: i32, %arg1: memref<256x256xf32, #tpu.memory_space<vmem>>, %arg2: memref<256x128xf32, #tpu.memory_space<vmem>>, %arg3: memref<256x128xf32, #tpu.memory_space<vmem>>) attributes {dimension_semantics = [#tpu.dimension_semantics<parallel>], iteration_bounds = array<i64: 2>, scalar_prefetch = 0 : i64, scratch_operands = 0 : i64, tpu.core_type = #tpu.core_type<tc>, window_params = [{transform_indices = @transform_0, window_bounds = array<i64: 256, 256>}, {pipeline_mode = #tpu.pipeline_mode<synchronous>, transform_indices = @transform_1, window_bounds = array<i64: 256, 128>}, {transform_indices = @transform_2, window_bounds = array<i64: 256, 128>}]} {
    %c0 = arith.constant 0 : index
    %c0_0 = arith.constant 0 : index
    %0 = vector.load %arg1[%c0, %c0_0] : memref<256x256xf32, #tpu.memory_space<vmem>>, vector<256x256xf32>
    %c0_1 = arith.constant 0 : index
    %c0_2 = arith.constant 0 : index
    %1 = vector.load %arg2[%c0_1, %c0_2] : memref<256x128xf32, #tpu.memory_space<vmem>>, vector<256x128xf32>
    %cst = arith.constant dense<0.000000e+00> : vector<256x128xf32>
    %2 = tpu.matmul %0, %1, %cst {dimension_numbers = #tpu.dot_dimension_numbers<[1], [0], [0], [1], [0, 0, 1, 1], [], []>} : vector<256x256xf32>, vector<256x128xf32>, vector<256x128xf32> -> vector<256x128xf32>
    %c0_3 = arith.constant 0 : index
    %c0_4 = arith.constant 0 : index
    %3 = vector.load %arg3[%c0_3, %c0_4] : memref<256x128xf32, #tpu.memory_space<vmem>>, vector<256x128xf32>
    tpu.vector_store %arg3[%c0_3, %c0_4], %2 {strides = array<i32>} : memref<256x128xf32, #tpu.memory_space<vmem>>, vector<256x128xf32>,
    return
  }
  func.func @transform_0(%arg0: i32) -> (i32, i32) {
    %c0_i32 = arith.constant 0 : i32
    %c0_i32_0 = arith.constant 0 : i32
    return %arg0, %c0_i32 : i32, i32
  }
  func.func @transform_1(%arg0: i32) -> (i32, i32) {
    %c0_i32 = arith.constant 0 : i32
    %c0_i32_0 = arith.constant 0 : i32
    %c0_i32_1 = arith.constant 0 : i32
    return %c0_i32, %c0_i32_0 : i32, i32
  }
  func.func @transform_2(%arg0: i32) -> (i32, i32) {
    %c0_i32 = arith.constant 0 : i32
    %c0_i32_0 = arith.constant 0 : i32
    return %arg0, %c0_i32 : i32, i32
  }
}

</mosaic_0001>

<bundles_post_ra>
// kernel: tpu_custom_call.1
= control target key start
LH: loop header
LB: loop body
LE: loop exit
PB: predicated region body
PF: predicated region fallthrough
CT: control target
= control target key end

     0   :  { %7 = vsyncpa [#allocation3], 0  ;;  %s1284_s0 = inlined_call_operand.hbm [shape: f32[512,256], index: 0, kind: input, shape index: {}]   ;;  %s1285_s1 = inlined_call_operand.hbm [shape: f32[256,128], index: 1, kind: input, shape index: {}]   ;;  %s1286_s2 = inlined_call_operand.hbm [shape: f32[512,128], index: 2, kind: output, shape index: {}]  }
   0x1   :  { %9 = vsyncpa [#allocation3 + $0x1], 0 }
   0x2   :  { %10 = vsyncpa [#allocation6], 0 }
   0x3   :  { %11 = vsyncpa [#allocation4], 0 }
   0x4   :  { %13 = vsyncpa [#allocation4 + $0x1], 0  ;;  %s949_s9 = smov 0   ;;  %s951_s10 = smov 0  }
   0x5   :  { %s953_s11 = smov 0   ;;  %s955_s12 = smov 0  }
   0x6 LB: > { %s970_s13 = sadd.s32 4294967295, %s922_s12   ;;  %s630_s14 = sadd.s32 4294967294, %s922_s12   ;;  %s922_s12 = sphi %s955_s12, %s1306_s12   ;;  %s918_s11 = sphi %s953_s11, %s1305_s11   ;;  %s914_s10 = sphi %s951_s10, %s1304_s10   ;;  %s910_s9 = sphi %s949_s9, %s1303_s9  }
   0x7   : > { %p39_p0 = scmp.ne.s32.totalorder %s914_s10, %s910_s9  ;;  %p1287_p1 = scmp.eq.s32.totalorder %s970_s13, 0 }
   0x8   : > { %p90_p3 = scmp.eq.s32.totalorder %s630_s14, 1  ;;  %p631_p5 = scmp.ge.s32.totalorder %s922_s12, 1 }
   0x9   : > { %p979_p4 = por %p1287_p1, %p39_p0  ;;  %p97_p7 = scmp.lt.s32.totalorder %s922_s12, 3 }
   0xa   : > { %p984_p6 = por %p90_p3, %p39_p0  ;;  %s924_s18 = smov [#allocation5]  }
   0xb   : > { %s1290_s15 = scalar_select %p979_p4, 1, 0 }
   0xc   : > { %s1291_s16 = scalar_select %p984_p6, 1, 0 }
   0xd   : > { %p989_p8 = pnand %p631_p5, %p97_p7  ;;  %s109_s19 = sshll.u32 %s924_s18, 4  ;;  %s993_s19 = int_to_ptr.vmem [resolvable:$true] %s109_s19 }
   0xe   : > { %s1005_s21 = sadd.s32 1, %s922_s12   ;;  %s26_s22 = sadd.s32 1, %s918_s11 }
   0xf   : > { %s1292_s17 = scalar_select %p989_p8, 1, 0 }
  0x10   : > { %p738_p9 = pneg %p989_p8  ;;  %s23_s23 = ssub.s32 %s922_s12, %s1005_s21 }
  0x11   : > { %s794_s26 = scalar_lea.hbm %s1285_s1, 4096 }
  0x12   : > { %p1000_p11 = pnand %p738_p9, %p1287_p1  ;;  %p795_p12 = scmp.ne.s32.totalorder %s1285_s1, %s794_s26 }
  0x13   : > { %p801_p5 = scmp.lt.u32.totalorder %s794_s26, %s1285_s1 }
  0x14   : > { %p796_p13 = pneg %p1000_p11 }
  0x16   : > { %p797_p0 = pnand %p796_p13, %p795_p12 }
  0x18   : > { %p798_p3 = pneg %p797_p0 }
  0x1a   : > { %p803_p7 = pnand %p801_p5, %p798_p3 }
  0x1c   : > { %806 = shalt.err (!%p803_p7)
}
  0x1d   : > { %s807_s3 = scalar_lea.vmem %s993_s19, 4096  ;;  %p815_p2 = scmp.lt.s32.totalorder %s993_s19, %s993_s19 }
  0x1e   : > { %p808_p9 = scmp.ne.s32.totalorder %s993_s19, %s807_s3  ;;  %p816_p6 = scmp.lt.s32.totalorder %s807_s3, %s807_s3 }
  0x20   : > { %p810_p10 = pnand %p808_p9, %p796_p13  ;;  %p817_p4 = por %p816_p6, %p815_p2 }
  0x22   : > { %p811_p1 = pneg %p810_p10 }
  0x24   : > { %p818_p8 = pnand %p817_p4, %p811_p1 }
  0x26   : > { %821 = shalt.err (!%p818_p8)
}
  0x27   : > { %s925_s4 = smov 128   ;;  %s926_s5 = smov 8  }
  0x28   : > { %741 = dma.hbm_to_vmem [thread:$0]  (!%p1000_p11), %s1285_s1, 4096, %s993_s19, [#allocation6], %s925_s4, %s925_s4, %s926_s5  }
  0x29   : > { %p24_p2 = scmp.eq.s32.totalorder %s23_s23, 0  ;;  %p33_p1 = scmp.ne.s32.totalorder %s918_s11, %s914_s10 }
  0x2a   : > { %p34_p4 = scmp.eq.s32.totalorder %s922_s12, 0  ;;  %p751_p6 = scmp.lt.s32.totalorder %s922_s12, 2 }
  0x2b   : > { %s1036_s8 = scalar_select %p24_p2, %s918_s11, %s26_s22  }
  0x2c   : > { %p35_p8 = por %p34_p4, %p33_p1  ;;  %p1294_p10 = scmp.eq.s32.totalorder %s970_s13, 1 }
  0x2d   : > { %s123_s18 = sand.u32 1, %s918_s11   ;;  %s648_s24 = sshll.u32 %s922_s12, 13 }
  0x2e   : > { %p1040_p12 = por %p1294_p10, %p33_p1  ;;  %s634_s25 = sshll.u32 %s123_s18, 9 }
  0x2f   : > { %s1049_s27 = scalar_lea.hbm %s1284_s0, %s648_s24  ;;  %s127_s19 = scalar_lea.vmem [#allocation2], %s634_s25 }
  0x30   : > { %s135_s22 = sshll.u32 %s127_s19, 4  ;;  %p1051_p11 = pnand %p751_p6, %p35_p8  ;;  %s1055_s22 = int_to_ptr.vmem [resolvable:$true] %s135_s22 }
  0x31   : > { %s1057_s28 = scalar_lea.sflag [#allocation3], %s123_s18  ;;  %s822_s29 = scalar_lea.hbm %s1049_s27, 8192 }
  0x32   : > { %p823_p13 = scmp.ne.s32.totalorder %s1049_s27, %s822_s29  ;;  %p824_p0 = pneg %p1051_p11 }
  0x33   : > { %s827_s4 = scalar_lea.hbm %s1284_s0, 16384  ;;  %p828_p7 = scmp.lt.u32.totalorder %s1049_s27, %s1284_s0 }
  0x34   : > { %p825_p3 = pnand %p824_p0, %p823_p13  ;;  %p829_p9 = scmp.lt.u32.totalorder %s827_s4, %s822_s29 }
  0x35   : > { %p831_p1 = scmp.lt.u32.totalorder %s822_s29, %s1049_s27 }
  0x36   : > { %p826_p5 = pneg %p825_p3  ;;  %p830_p2 = por %p829_p9, %p828_p7 }
  0x38   : > { %p832_p4 = por %p831_p1, %p830_p2 }
  0x3a   : > { %p833_p6 = pnand %p832_p4, %p826_p5 }
  0x3c   : > { %836 = shalt.err (!%p833_p6)
}
  0x3d   : > { %s837_s7 = scalar_lea.vmem %s1055_s22, 8192  ;;  %s927_s18 = smov [#allocation2]  }
  0x3e   : > { %p838_p8 = scmp.ne.s32.totalorder %s1055_s22, %s837_s7  ;;  %s842_s24 = sshll.u32 %s927_s18, 4  ;;  %s843_s24 = int_to_ptr.vmem [resolvable:$false] %s842_s24 }
  0x3f   : > { %s844_s25 = scalar_lea.vmem %s843_s24, 16384  ;;  %p845_p3 = scmp.lt.s32.totalorder %s1055_s22, %s843_s24 }
  0x40   : > { %p840_p10 = pnand %p838_p8, %p824_p0  ;;  %p846_p7 = scmp.lt.s32.totalorder %s844_s25, %s837_s7 }
  0x42   : > { %p841_p13 = pneg %p840_p10  ;;  %p847_p9 = por %p846_p7, %p845_p3 }
  0x44   : > { %p848_p2 = pnand %p847_p9, %p841_p13 }
  0x46   : > { %851 = shalt.err (!%p848_p2)
}
  0x47   : > { %s928_s20 = smov 256   ;;  %s929_s26 = smov 16  }
  0x48   : > { %745 = dma.hbm_to_vmem [thread:$0]  (!%p1051_p11), %s1049_s27, 8192, %s1055_s22, %s1057_s28, %s928_s20, %s928_s20, %s929_s26  }
  0x49   : > { %p1297_p0 = scmp.ne.s32.totalorder %s1292_s17, 0 }
  0x4a   : > { %s1088_s19 = sand.u32 (!%p1297_p0), 1, %s914_s10   ;;  %p1298_p5 = scmp.ne.s32.totalorder (!%p1297_p0), %s1290_s15, 0 }
  0x4b   : > { %147 = sbr.rel (%p1297_p0) target bundleno = 439 (0x1b7), region = 28  ;;  %s639_s29 = sshll.u32 (!%p1297_p0), %s1088_s19, 9 }
  0x4c   : > { %s150_s30 = scalar_lea.sflag (!%p1297_p0), [#allocation3], %s1088_s19  ;;  %s1092_s3 = scalar_lea.vmem (!%p1297_p0), [#allocation2], %s639_s29 }
  0x52   : > { %897 = dma.done.wait (%p1298_p5), %s150_s30, 8192  }
  0x53   : > { %899 = vsyncadd (%p1298_p5), %s150_s30, 4294959104  ;;  %p1299_p11 = scmp.eq.s32.totalorder %s970_s13, 0 }
  0x55   : > { %901 = dma.done.wait (%p1299_p11), [#allocation6], 4096   ;;  %p1300_p1 = pmov %p1299_p11 }
  0x56   : > { %v930_v0 = vmov 0.0|0.0   ;;  %v244_v1 = vld [vmem:[#allocation5] sm:$0xff]  ;;  %v245_v2 = vld [vmem:[#allocation5 + $0x8] sm:$0xff]  ;;  %v246_v3 = vld [vmem:[#allocation5 + $0x10] sm:$0xff]  ;;  %s641_s15 = sshll.u32 %s1088_s19, 8  ;;  %s649_s27 = sshll.u32 %s970_s13, 12 }
  0x57   : > { %903 = vsyncadd (%p1300_p1), [#allocation6], 4294963200  ;;  %650 = vmatprep.subr.bf16.mxu0 %v930_v0  ;;  %698 = vmatprep.subr.bf16.mxu1 %v930_v0  ;;  %v651_v4 = vpack.c.bf16 %v245_v2, %v244_v1  ;;  %v247_v5 = vld [vmem:[#allocation5 + $0x18] sm:$0xff]  ;;  %v248_v7 = vld [vmem:[#allocation5 + $0x20] sm:$0xff]  ;;  %s1199_s17 = scalar_lea.vmem [#allocation7], %s641_s15  ;;  %s1236_s4 = scalar_lea.hbm %s1286_s2, %s649_s27 }
  0x58   : > { %v654_v6 = vpack.c.bf16 %v247_v5, %v246_v3  ;;  %v249_v8 = vld [vmem:[#allocation5 + $0x28] sm:$0xff]  ;;  %v250_v10 = vld [vmem:[#allocation5 + $0x30] sm:$0xff]  ;;  %v251_v11 = vld [vmem:[#allocation5 + $0x38] sm:$0xff]  ;;  %s547_s22 = sshll.u32 %s1199_s17, 4  ;;  %s534_s13 = scalar_lea.sflag [#allocation4], %s1088_s19  ;;  %s1238_s22 = int_to_ptr.vmem [resolvable:$true] %s547_s22 }
  0x59   : > { %652 = vmatpush1.bf16.msra.mxu0 %v651_v4  ;;  %714 = vmatpush1.bf16.msra.mxu1 %v651_v4  ;;  %v657_v9 = vpack.c.bf16 %v249_v8, %v248_v7  ;;  %v181_v12 = vld [vmem:[%s1092_s3 + $0x8] sm:$0xff]  ;;  %v660_v13 = vpack.c.bf16 %v251_v11, %v250_v10  ;;  %v252_v15 = vld [vmem:[#allocation5 + $0x40] sm:$0xff]  ;;  %v254_v18 = vld [vmem:[#allocation5 + $0x50] sm:$0xff]  ;;  %s852_s5 = scalar_lea.vmem %s1238_s22, 4096  ;;  %s931_s6 = smov [#allocation7]  }
  0x5a   : > { %653 = vmatprep.subr.bf16.mxu0 %v930_v0  ;;  %699 = vmatprep.subr.bf16.mxu1 %v930_v0  ;;  %v213_v14 = vld [vmem:[%s1092_s3 + $0x108] sm:$0xff]  ;;  %v255_v19 = vld [vmem:[#allocation5 + $0x58] sm:$0xff]  ;;  %v256_v21 = vld [vmem:[#allocation5 + $0x60] sm:$0xff]  ;;  %p853_p4 = scmp.ne.s32.totalorder %s1238_s22, %s852_s5  ;;  %s856_s7 = sshll.u32 %s931_s6, 4  ;;  %s857_s7 = int_to_ptr.vmem [resolvable:$false] %s856_s7 }
  0x5b   : > { %v253_v16 = vld [vmem:[#allocation5 + $0x48] sm:$0xff]  ;;  %340 = vmatprep.mubr.f32.mxu0 %v181_v12  ;;  %420 = vmatprep.mubr.f32.mxu1 %v213_v14  ;;  %v666_v20 = vpack.c.bf16 %v255_v19, %v254_v18  ;;  %v258_v24 = vld [vmem:[#allocation5 + $0x70] sm:$0xff]  ;;  %v259_v25 = vld [vmem:[#allocation5 + $0x78] sm:$0xff]  ;;  %s858_s18 = scalar_lea.vmem %s857_s7, 8192  ;;  %p859_p10 = scmp.lt.s32.totalorder %s1238_s22, %s857_s7 }
  0x5c   : > { %v663_v17 = vpack.c.bf16 %v253_v16, %v252_v15  ;;  %v257_v22 = vld [vmem:[#allocation5 + $0x68] sm:$0xff]  ;;  %v672_v26 = vpack.c.bf16 %v259_v25, %v258_v24  ;;  %v260_v27 = vld [vmem:[#allocation5 + $0x80] sm:$0xff]  ;;  %v262_v30 = vld [vmem:[#allocation5 + $0x90] sm:$0xff]  ;;  %p854_p6 = pnand %p853_p4, %p1040_p12  ;;  %p860_p13 = scmp.lt.s32.totalorder %s858_s18, %s852_s5 }
  0x5d   : > { %655 = vmatpush1.bf16.msra.mxu0 %v654_v6  ;;  %715 = vmatpush1.bf16.msra.mxu1 %v654_v6  ;;  %v669_v23 = vpack.c.bf16 %v257_v22, %v256_v21  ;;  %v261_v28 = vld [vmem:[#allocation5 + $0x88] sm:$0xff]  ;;  %v263_v31 = vld [vmem:[#allocation5 + $0x98] sm:$0xff]  ;;  %v264_v33 = vld [vmem:[#allocation5 + $0xa0] sm:$0xff] }
  0x5e   : > { %656 = vmatprep.subr.bf16.mxu0 %v930_v0  ;;  %700 = vmatprep.subr.bf16.mxu1 %v930_v0  ;;  %v675_v29 = vpack.c.bf16 %v261_v28, %v260_v27  ;;  %v678_v32 = vpack.c.bf16 %v263_v31, %v262_v30  ;;  %v265_v34 = vld [vmem:[#allocation5 + $0xa8] sm:$0xff]  ;;  %v266_v36 = vld [vmem:[#allocation5 + $0xb0] sm:$0xff]  ;;  %v267_v37 = vld [vmem:[#allocation5 + $0xb8] sm:$0xff]  ;;  %p855_p8 = pneg %p854_p6  ;;  %p861_p3 = por %p860_p13, %p859_p10 }
  0x5f   : > { %v681_v35 = vpack.c.bf16 %v265_v34, %v264_v33  ;;  %v684_v38 = vpack.c.bf16 %v267_v37, %v266_v36  ;;  %v268_v39 = vld [vmem:[#allocation5 + $0xc0] sm:$0xff]  ;;  %v269_v40 = vld [vmem:[#allocation5 + $0xc8] sm:$0xff]  ;;  %v270_v42 = vld [vmem:[#allocation5 + $0xd0] sm:$0xff] }
  0x60   : > { %v687_v41 = vpack.c.bf16 %v269_v40, %v268_v39  ;;  %v271_v43 = vld [vmem:[#allocation5 + $0xd8] sm:$0xff]  ;;  %v272_v45 = vld [vmem:[#allocation5 + $0xe0] sm:$0xff]  ;;  %v273_v46 = vld [vmem:[#allocation5 + $0xe8] sm:$0xff]  ;;  %p862_p7 = pnand %p861_p3, %p855_p8 }
  0x61   : > { %658 = vmatpush1.bf16.msra.mxu0 %v657_v9  ;;  %716 = vmatpush1.bf16.msra.mxu1 %v657_v9  ;;  %v690_v44 = vpack.c.bf16 %v271_v43, %v270_v42  ;;  %v693_v47 = vpack.c.bf16 %v273_v46, %v272_v45  ;;  %v274_v48 = vld [vmem:[#allocation5 + $0xf0] sm:$0xff]  ;;  %v275_v49 = vld [vmem:[#allocation5 + $0xf8] sm:$0xff]  ;;  %v180_v51 = vld [vmem:[%s1092_s3] sm:$0xff] }
  0x62   : > { %659 = vmatprep.subr.bf16.mxu0 %v930_v0  ;;  %701 = vmatprep.subr.bf16.mxu1 %v930_v0  ;;  %v696_v50 = vpack.c.bf16 %v275_v49, %v274_v48  ;;  %v212_v52 = vld [vmem:[%s1092_s3 + $0x100] sm:$0xff]  ;;  %v183_v53 = vld [vmem:[%s1092_s3 + $0x18] sm:$0xff]  ;;  %v182_v55 = vld [vmem:[%s1092_s3 + $0x10] sm:$0xff] }
  0x63   : > { %v215_v54 = vld [vmem:[%s1092_s3 + $0x118] sm:$0xff]  ;;  %v214_v56 = vld [vmem:[%s1092_s3 + $0x110] sm:$0xff]  ;;  %v185_v57 = vld [vmem:[%s1092_s3 + $0x28] sm:$0xff] }
  0x64   : > { %v217_v58 = vld [vmem:[%s1092_s3 + $0x128] sm:$0xff]  ;;  %v184_v59 = vld [vmem:[%s1092_s3 + $0x20] sm:$0xff]  ;;  %v187_v61 = vld [vmem:[%s1092_s3 + $0x38] sm:$0xff] }
  0x65   : > { %661 = vmatpush1.bf16.msra.mxu0 %v660_v13  ;;  %717 = vmatpush1.bf16.msra.mxu1 %v660_v13  ;;  %v216_v60 = vld [vmem:[%s1092_s3 + $0x120] sm:$0xff]  ;;  %v219_v62 = vld [vmem:[%s1092_s3 + $0x138] sm:$0xff]  ;;  %v186_v63 = vld [vmem:[%s1092_s3 + $0x30] sm:$0xff] }
  0x66   : > { %662 = vmatprep.subr.bf16.mxu0 %v930_v0  ;;  %702 = vmatprep.subr.bf16.mxu1 %v930_v0  ;;  %v189_v1 = vld [vmem:[%s1092_s3 + $0x48] sm:$0xff]  ;;  %v188_v3 = vld [vmem:[%s1092_s3 + $0x40] sm:$0xff]  ;;  %v191_v5 = vld [vmem:[%s1092_s3 + $0x58] sm:$0xff] }
  0x67   : > { %v221_v2 = vld [vmem:[%s1092_s3 + $0x148] sm:$0xff]  ;;  %v220_v4 = vld [vmem:[%s1092_s3 + $0x140] sm:$0xff]  ;;  %v223_v6 = vld [vmem:[%s1092_s3 + $0x158] sm:$0xff] }
  0x68   : > { %v190_v7 = vld [vmem:[%s1092_s3 + $0x50] sm:$0xff]  ;;  %v193_v9 = vld [vmem:[%s1092_s3 + $0x68] sm:$0xff]  ;;  %v192_v11 = vld [vmem:[%s1092_s3 + $0x60] sm:$0xff] }
  0x69   : > { %664 = vmatpush1.bf16.msra.mxu0 %v663_v17  ;;  %718 = vmatpush1.bf16.msra.mxu1 %v663_v17  ;;  %v222_v8 = vld [vmem:[%s1092_s3 + $0x150] sm:$0xff]  ;;  %v225_v10 = vld [vmem:[%s1092_s3 + $0x168] sm:$0xff]  ;;  %v224_v12 = vld [vmem:[%s1092_s3 + $0x160] sm:$0xff] }
  0x6a   : > { %665 = vmatprep.subr.bf16.mxu0 %v930_v0  ;;  %703 = vmatprep.subr.bf16.mxu1 %v930_v0  ;;  %v195_v13 = vld [vmem:[%s1092_s3 + $0x78] sm:$0xff]  ;;  %v194_v15 = vld [vmem:[%s1092_s3 + $0x70] sm:$0xff]  ;;  %v197_v17 = vld [vmem:[%s1092_s3 + $0x88] sm:$0xff] }
  0x6b   : > { %v227_v14 = vld [vmem:[%s1092_s3 + $0x178] sm:$0xff]  ;;  %v226_v16 = vld [vmem:[%s1092_s3 + $0x170] sm:$0xff]  ;;  %v229_v18 = vld [vmem:[%s1092_s3 + $0x188] sm:$0xff] }
  0x6c   : > { %v196_v19 = vld [vmem:[%s1092_s3 + $0x80] sm:$0xff]  ;;  %v199_v21 = vld [vmem:[%s1092_s3 + $0x98] sm:$0xff]  ;;  %v230_v24 = vld [vmem:[%s1092_s3 + $0x190] sm:$0xff] }
  0x6d   : > { %667 = vmatpush1.bf16.msra.mxu0 %v666_v20  ;;  %719 = vmatpush1.bf16.msra.mxu1 %v666_v20  ;;  %v228_v20 = vld [vmem:[%s1092_s3 + $0x180] sm:$0xff]  ;;  %v231_v22 = vld [vmem:[%s1092_s3 + $0x198] sm:$0xff]  ;;  %v201_v25 = vld [vmem:[%s1092_s3 + $0xa8] sm:$0xff] }
  0x6e   : > { %668 = vmatprep.subr.bf16.mxu0 %v930_v0  ;;  %704 = vmatprep.subr.bf16.mxu1 %v930_v0  ;;  %v200_v27 = vld [vmem:[%s1092_s3 + $0xa0] sm:$0xff]  ;;  %v235_v30 = vld [vmem:[%s1092_s3 + $0x1b8] sm:$0xff]  ;;  %v202_v31 = vld [vmem:[%s1092_s3 + $0xb0] sm:$0xff] }
  0x6f   : > { %v232_v28 = vld [vmem:[%s1092_s3 + $0x1a0] sm:$0xff]  ;;  %v205_v33 = vld [vmem:[%s1092_s3 + $0xc8] sm:$0xff]  ;;  %v207_v37 = vld [vmem:[%s1092_s3 + $0xd8] sm:$0xff] }
  0x70   : > { %v237_v34 = vld [vmem:[%s1092_s3 + $0x1c8] sm:$0xff]  ;;  %v236_v36 = vld [vmem:[%s1092_s3 + $0x1c0] sm:$0xff]  ;;  %v206_v39 = vld [vmem:[%s1092_s3 + $0xd0] sm:$0xff] }
  0x71   : > { %670 = vmatpush1.bf16.msra.mxu0 %v669_v23  ;;  %720 = vmatpush1.bf16.msra.mxu1 %v669_v23  ;;  %v198_v23 = vld [vmem:[%s1092_s3 + $0x90] sm:$0xff]  ;;  %v241_v42 = vld [vmem:[%s1092_s3 + $0x1e8] sm:$0xff]  ;;  %v208_v43 = vld [vmem:[%s1092_s3 + $0xe0] sm:$0xff] }
  0x72   : > { %671 = vmatprep.subr.bf16.mxu0 %v930_v0  ;;  %705 = vmatprep.subr.bf16.mxu1 %v930_v0  ;;  %v238_v40 = vld [vmem:[%s1092_s3 + $0x1d0] sm:$0xff]  ;;  %v211_v45 = vld [vmem:[%s1092_s3 + $0xf8] sm:$0xff] }
  0x73   : > { %v243_v46 = vld [vmem:[%s1092_s3 + $0x1f8] sm:$0xff]  ;;  %v242_v48 = vld [vmem:[%s1092_s3 + $0x1f0] sm:$0xff] }
  0x75   : > { %673 = vmatpush1.bf16.msra.mxu0 %v672_v26  ;;  %721 = vmatpush1.bf16.msra.mxu1 %v672_v26  ;;  %v233_v26 = vld [vmem:[%s1092_s3 + $0x1a8] sm:$0xff] }
  0x76   : > { %674 = vmatprep.subr.bf16.mxu0 %v930_v0  ;;  %706 = vmatprep.subr.bf16.mxu1 %v930_v0 }
  0x79   : > { %676 = vmatpush1.bf16.msra.mxu0 %v675_v29  ;;  %722 = vmatpush1.bf16.msra.mxu1 %v675_v29  ;;  %v203_v29 = vld [vmem:[%s1092_s3 + $0xb8] sm:$0xff] }
  0x7a   : > { %677 = vmatprep.subr.bf16.mxu0 %v930_v0  ;;  %707 = vmatprep.subr.bf16.mxu1 %v930_v0 }
  0x7d   : > { %679 = vmatpush1.bf16.msra.mxu0 %v678_v32  ;;  %723 = vmatpush1.bf16.msra.mxu1 %v678_v32  ;;  %v234_v32 = vld [vmem:[%s1092_s3 + $0x1b0] sm:$0xff] }
  0x7e   : > { %680 = vmatprep.subr.bf16.mxu0 %v930_v0  ;;  %708 = vmatprep.subr.bf16.mxu1 %v930_v0 }
  0x81   : > { %682 = vmatpush1.bf16.msra.mxu0 %v681_v35  ;;  %724 = vmatpush1.bf16.msra.mxu1 %v681_v35  ;;  %v204_v35 = vld [vmem:[%s1092_s3 + $0xc0] sm:$0xff] }
  0x82   : > { %683 = vmatprep.subr.bf16.mxu0 %v930_v0  ;;  %709 = vmatprep.subr.bf16.mxu1 %v930_v0 }
  0x85   : > { %685 = vmatpush1.bf16.msra.mxu0 %v684_v38  ;;  %725 = vmatpush1.bf16.msra.mxu1 %v684_v38  ;;  %v239_v38 = vld [vmem:[%s1092_s3 + $0x1d8] sm:$0xff] }
  0x86   : > { %686 = vmatprep.subr.bf16.mxu0 %v930_v0  ;;  %710 = vmatprep.subr.bf16.mxu1 %v930_v0 }
  0x89   : > { %688 = vmatpush1.bf16.msra.mxu0 %v687_v41  ;;  %726 = vmatpush1.bf16.msra.mxu1 %v687_v41  ;;  %v209_v41 = vld [vmem:[%s1092_s3 + $0xe8] sm:$0xff] }
  0x8a   : > { %689 = vmatprep.subr.bf16.mxu0 %v930_v0  ;;  %711 = vmatprep.subr.bf16.mxu1 %v930_v0 }
  0x8d   : > { %691 = vmatpush1.bf16.msra.mxu0 %v690_v44  ;;  %727 = vmatpush1.bf16.msra.mxu1 %v690_v44  ;;  %v240_v44 = vld [vmem:[%s1092_s3 + $0x1e0] sm:$0xff] }
  0x8e   : > { %692 = vmatprep.subr.bf16.mxu0 %v930_v0  ;;  %712 = vmatprep.subr.bf16.mxu1 %v930_v0 }
  0x91   : > { %694 = vmatpush1.bf16.msra.mxu0 %v693_v47  ;;  %728 = vmatpush1.bf16.msra.mxu1 %v693_v47  ;;  %v210_v47 = vld [vmem:[%s1092_s3 + $0xf0] sm:$0xff] }
  0x92   : > { %695 = vmatprep.subr.bf16.mxu0 %v930_v0  ;;  %713 = vmatprep.subr.bf16.mxu1 %v930_v0  ;;  %v218_v0 = vld [vmem:[%s1092_s3 + $0x130] sm:$0xff] }
  0x95   : > { %697 = vmatpush1.bf16.msra.mxu0 %v696_v50  ;;  %729 = vmatpush1.bf16.msra.mxu1 %v696_v50 }
  0x98   : > { %341 = vmatmul.mubr.f32.vlgmr.msra.gmra.mrb[0].mxu0 %v180_v51  ;;  %421 = vmatmul.mubr.f32.vlgmr.msra.gmra.mrb[0].mxu1 %v212_v52 }
  0x99   : > { %345 = vmatprep.mubr.f32.mxu0 %v183_v53  ;;  %425 = vmatprep.mubr.f32.mxu1 %v215_v54 }
  0x9c   : > { %346 = vmatmul.mubr.f32.gmra.mrb[2].mxu0 %v182_v55  ;;  %426 = vmatmul.mubr.f32.gmra.mrb[2].mxu1 %v214_v56 }
  0x9d   : > { %350 = vmatprep.mubr.f32.mxu0 %v185_v57  ;;  %430 = vmatprep.mubr.f32.mxu1 %v217_v58 }
  0xa0   : > { %351 = vmatmul.mubr.f32.gmra.mrb[4].mxu0 %v184_v59  ;;  %431 = vmatmul.mubr.f32.gmra.mrb[4].mxu1 %v216_v60 }
  0xa1   : > { %355 = vmatprep.mubr.f32.mxu0 %v187_v61  ;;  %435 = vmatprep.mubr.f32.mxu1 %v219_v62 }
  0xa4   : > { %356 = vmatmul.mubr.f32.gmra.mrb[6].mxu0 %v186_v63  ;;  %436 = vmatmul.mubr.f32.gmra.mrb[6].mxu1 %v218_v0 }
  0xa5   : > { %360 = vmatprep.mubr.f32.mxu0 %v189_v1  ;;  %440 = vmatprep.mubr.f32.mxu1 %v221_v2 }
  0xa8   : > { %361 = vmatmul.mubr.f32.gmra.mrb[8].mxu0 %v188_v3  ;;  %441 = vmatmul.mubr.f32.gmra.mrb[8].mxu1 %v220_v4 }
  0xa9   : > { %365 = vmatprep.mubr.f32.mxu0 %v191_v5  ;;  %445 = vmatprep.mubr.f32.mxu1 %v223_v6 }
  0xac   : > { %366 = vmatmul.mubr.f32.gmra.mrb[10].mxu0 %v190_v7  ;;  %446 = vmatmul.mubr.f32.gmra.mrb[10].mxu1 %v222_v8 }
  0xad   : > { %370 = vmatprep.mubr.f32.mxu0 %v193_v9  ;;  %450 = vmatprep.mubr.f32.mxu1 %v225_v10 }
  0xb0   : > { %371 = vmatmul.mubr.f32.gmra.mrb[12].mxu0 %v192_v11  ;;  %451 = vmatmul.mubr.f32.gmra.mrb[12].mxu1 %v224_v12 }
  0xb1   : > { %375 = vmatprep.mubr.f32.mxu0 %v195_v13  ;;  %455 = vmatprep.mubr.f32.mxu1 %v227_v14 }
  0xb4   : > { %376 = vmatmul.mubr.f32.gmra.mrb[14].mxu0 %v194_v15  ;;  %456 = vmatmul.mubr.f32.gmra.mrb[14].mxu1 %v226_v16 }
  0xb5   : > { %380 = vmatprep.mubr.f32.mxu0 %v197_v17  ;;  %460 = vmatprep.mubr.f32.mxu1 %v229_v18 }
  0xb8   : > { %381 = vmatmul.mubr.f32.gmra.mrb[16].mxu0 %v196_v19  ;;  %461 = vmatmul.mubr.f32.gmra.mrb[16].mxu1 %v228_v20 }
  0xb9   : > { %385 = vmatprep.mubr.f32.mxu0 %v199_v21  ;;  %465 = vmatprep.mubr.f32.mxu1 %v231_v22 }
  0xbc   : > { %386 = vmatmul.mubr.f32.gmra.mrb[18].mxu0 %v198_v23  ;;  %466 = vmatmul.mubr.f32.gmra.mrb[18].mxu1 %v230_v24 }
  0xbd   : > { %390 = vmatprep.mubr.f32.mxu0 %v201_v25  ;;  %470 = vmatprep.mubr.f32.mxu1 %v233_v26 }
  0xc0   : > { %391 = vmatmul.mubr.f32.gmra.mrb[20].mxu0 %v200_v27  ;;  %471 = vmatmul.mubr.f32.gmra.mrb[20].mxu1 %v232_v28 }
  0xc1   : > { %395 = vmatprep.mubr.f32.mxu0 %v203_v29  ;;  %475 = vmatprep.mubr.f32.mxu1 %v235_v30 }
  0xc4   : > { %396 = vmatmul.mubr.f32.gmra.mrb[22].mxu0 %v202_v31  ;;  %476 = vmatmul.mubr.f32.gmra.mrb[22].mxu1 %v234_v32 }
  0xc5   : > { %400 = vmatprep.mubr.f32.mxu0 %v205_v33  ;;  %480 = vmatprep.mubr.f32.mxu1 %v237_v34 }
  0xc8   : > { %401 = vmatmul.mubr.f32.gmra.mrb[24].mxu0 %v204_v35  ;;  %481 = vmatmul.mubr.f32.gmra.mrb[24].mxu1 %v236_v36 }
  0xc9   : > { %405 = vmatprep.mubr.f32.mxu0 %v207_v37  ;;  %485 = vmatprep.mubr.f32.mxu1 %v239_v38 }
  0xcc   : > { %406 = vmatmul.mubr.f32.gmra.mrb[26].mxu0 %v206_v39  ;;  %486 = vmatmul.mubr.f32.gmra.mrb[26].mxu1 %v238_v40 }
  0xcd   : > { %410 = vmatprep.mubr.f32.mxu0 %v209_v41  ;;  %490 = vmatprep.mubr.f32.mxu1 %v241_v42 }
  0xd0   : > { %411 = vmatmul.mubr.f32.gmra.mrb[28].mxu0 %v208_v43  ;;  %491 = vmatmul.mubr.f32.gmra.mrb[28].mxu1 %v240_v44 }
  0xd1   : > { %415 = vmatprep.mubr.f32.mxu0 %v211_v45  ;;  %495 = vmatprep.mubr.f32.mxu1 %v243_v46 }
  0xd4   : > { %416 = vmatmul.mubr.f32.gmra.mrb[30].mxu0 %v210_v47  ;;  %496 = vmatmul.mubr.f32.gmra.mrb[30].mxu1 %v242_v48 }
 0x16b   : > { %v342_v49 = vpop.f32.mrb[0].mxu0  ;;  %v422_v50 = vpop.f32.mrb[0].mxu1 }
 0x16c   : > { %501 = vst [vmem:[%s1199_s17] sm:$0xff] %v342_v49  ;;  %517 = vst [vmem:[%s1199_s17 + $0x80] sm:$0xff] %v422_v50  ;;  %v344_v51 = vpop.f32.mrb[1].mxu0  ;;  %v424_v52 = vpop.f32.mrb[1].mxu1 }
 0x16f   : > { %v347_v53 = vpop.f32.mrb[2].mxu0  ;;  %v427_v54 = vpop.f32.mrb[2].mxu1 }
 0x170   : > { %502 = vst [vmem:[%s1199_s17 + $0x8] sm:$0xff] %v347_v53  ;;  %518 = vst [vmem:[%s1199_s17 + $0x88] sm:$0xff] %v427_v54  ;;  %v349_v55 = vpop.f32.mrb[3].mxu0  ;;  %v429_v56 = vpop.f32.mrb[3].mxu1 }
 0x173   : > { %v352_v57 = vpop.f32.mrb[4].mxu0  ;;  %v432_v58 = vpop.f32.mrb[4].mxu1 }
 0x174   : > { %503 = vst [vmem:[%s1199_s17 + $0x10] sm:$0xff] %v352_v57  ;;  %519 = vst [vmem:[%s1199_s17 + $0x90] sm:$0xff] %v432_v58  ;;  %v354_v59 = vpop.f32.mrb[5].mxu0  ;;  %v434_v60 = vpop.f32.mrb[5].mxu1 }
 0x177   : > { %v357_v61 = vpop.f32.mrb[6].mxu0  ;;  %v437_v62 = vpop.f32.mrb[6].mxu1 }
 0x178   : > { %504 = vst [vmem:[%s1199_s17 + $0x18] sm:$0xff] %v357_v61  ;;  %520 = vst [vmem:[%s1199_s17 + $0x98] sm:$0xff] %v437_v62  ;;  %v359_v63 = vpop.f32.mrb[7].mxu0  ;;  %v439_v0 = vpop.f32.mrb[7].mxu1 }
 0x17b   : > { %v362_v1 = vpop.f32.mrb[8].mxu0  ;;  %v442_v2 = vpop.f32.mrb[8].mxu1 }
 0x17c   : > { %505 = vst [vmem:[%s1199_s17 + $0x20] sm:$0xff] %v362_v1  ;;  %521 = vst [vmem:[%s1199_s17 + $0xa0] sm:$0xff] %v442_v2  ;;  %v364_v3 = vpop.f32.mrb[9].mxu0  ;;  %v444_v4 = vpop.f32.mrb[9].mxu1 }
 0x17f   : > { %v367_v5 = vpop.f32.mrb[10].mxu0  ;;  %v447_v6 = vpop.f32.mrb[10].mxu1 }
 0x180   : > { %506 = vst [vmem:[%s1199_s17 + $0x28] sm:$0xff] %v367_v5  ;;  %522 = vst [vmem:[%s1199_s17 + $0xa8] sm:$0xff] %v447_v6  ;;  %v369_v7 = vpop.f32.mrb[11].mxu0  ;;  %v449_v8 = vpop.f32.mrb[11].mxu1 }
 0x183   : > { %v372_v9 = vpop.f32.mrb[12].mxu0  ;;  %v452_v10 = vpop.f32.mrb[12].mxu1 }
 0x184   : > { %507 = vst [vmem:[%s1199_s17 + $0x30] sm:$0xff] %v372_v9  ;;  %523 = vst [vmem:[%s1199_s17 + $0xb0] sm:$0xff] %v452_v10  ;;  %v374_v11 = vpop.f32.mrb[13].mxu0  ;;  %v454_v12 = vpop.f32.mrb[13].mxu1 }
 0x187   : > { %v377_v13 = vpop.f32.mrb[14].mxu0  ;;  %v457_v14 = vpop.f32.mrb[14].mxu1 }
 0x188   : > { %508 = vst [vmem:[%s1199_s17 + $0x38] sm:$0xff] %v377_v13  ;;  %524 = vst [vmem:[%s1199_s17 + $0xb8] sm:$0xff] %v457_v14  ;;  %v379_v15 = vpop.f32.mrb[15].mxu0  ;;  %v459_v16 = vpop.f32.mrb[15].mxu1 }
 0x18b   : > { %v382_v17 = vpop.f32.mrb[16].mxu0  ;;  %v462_v18 = vpop.f32.mrb[16].mxu1 }
 0x18c   : > { %509 = vst [vmem:[%s1199_s17 + $0x40] sm:$0xff] %v382_v17  ;;  %525 = vst [vmem:[%s1199_s17 + $0xc0] sm:$0xff] %v462_v18  ;;  %v384_v19 = vpop.f32.mrb[17].mxu0  ;;  %v464_v20 = vpop.f32.mrb[17].mxu1 }
 0x18f   : > { %v387_v21 = vpop.f32.mrb[18].mxu0  ;;  %v467_v22 = vpop.f32.mrb[18].mxu1 }
 0x190   : > { %510 = vst [vmem:[%s1199_s17 + $0x48] sm:$0xff] %v387_v21  ;;  %526 = vst [vmem:[%s1199_s17 + $0xc8] sm:$0xff] %v467_v22  ;;  %v389_v23 = vpop.f32.mrb[19].mxu0  ;;  %v469_v24 = vpop.f32.mrb[19].mxu1 }
 0x193   : > { %v392_v25 = vpop.f32.mrb[20].mxu0  ;;  %v472_v26 = vpop.f32.mrb[20].mxu1 }
 0x194   : > { %511 = vst [vmem:[%s1199_s17 + $0x50] sm:$0xff] %v392_v25  ;;  %527 = vst [vmem:[%s1199_s17 + $0xd0] sm:$0xff] %v472_v26  ;;  %v394_v27 = vpop.f32.mrb[21].mxu0  ;;  %v474_v28 = vpop.f32.mrb[21].mxu1 }
 0x197   : > { %v397_v29 = vpop.f32.mrb[22].mxu0  ;;  %v477_v30 = vpop.f32.mrb[22].mxu1 }
 0x198   : > { %512 = vst [vmem:[%s1199_s17 + $0x58] sm:$0xff] %v397_v29  ;;  %528 = vst [vmem:[%s1199_s17 + $0xd8] sm:$0xff] %v477_v30  ;;  %v399_v31 = vpop.f32.mrb[23].mxu0  ;;  %v479_v32 = vpop.f32.mrb[23].mxu1 }
 0x19b   : > { %v402_v33 = vpop.f32.mrb[24].mxu0  ;;  %v482_v34 = vpop.f32.mrb[24].mxu1 }
 0x19c   : > { %513 = vst [vmem:[%s1199_s17 + $0x60] sm:$0xff] %v402_v33  ;;  %529 = vst [vmem:[%s1199_s17 + $0xe0] sm:$0xff] %v482_v34  ;;  %v404_v35 = vpop.f32.mrb[25].mxu0  ;;  %v484_v36 = vpop.f32.mrb[25].mxu1 }
 0x19f   : > { %v407_v37 = vpop.f32.mrb[26].mxu0  ;;  %v487_v38 = vpop.f32.mrb[26].mxu1 }
 0x1a0   : > { %514 = vst [vmem:[%s1199_s17 + $0x68] sm:$0xff] %v407_v37  ;;  %530 = vst [vmem:[%s1199_s17 + $0xe8] sm:$0xff] %v487_v38  ;;  %v409_v39 = vpop.f32.mrb[27].mxu0  ;;  %v489_v40 = vpop.f32.mrb[27].mxu1 }
 0x1a3   : > { %v412_v41 = vpop.f32.mrb[28].mxu0  ;;  %v492_v42 = vpop.f32.mrb[28].mxu1 }
 0x1a4   : > { %515 = vst [vmem:[%s1199_s17 + $0x70] sm:$0xff] %v412_v41  ;;  %531 = vst [vmem:[%s1199_s17 + $0xf0] sm:$0xff] %v492_v42  ;;  %v414_v43 = vpop.f32.mrb[29].mxu0  ;;  %v494_v44 = vpop.f32.mrb[29].mxu1 }
 0x1a7   : > { %v417_v45 = vpop.f32.mrb[30].mxu0  ;;  %v497_v46 = vpop.f32.mrb[30].mxu1 }
 0x1a8   : > { %516 = vst [vmem:[%s1199_s17 + $0x78] sm:$0xff] %v417_v45  ;;  %532 = vst [vmem:[%s1199_s17 + $0xf8] sm:$0xff] %v497_v46  ;;  %v419_v47 = vpop.f32.mrb[31].mxu0  ;;  %v499_v48 = vpop.f32.mrb[31].mxu1 }
 0x1a9   : > { %865 = shalt.err (!%p862_p7)
}
 0x1aa   : > { %s866_s24 = scalar_lea.hbm %s1236_s4, 4096  ;;  %s870_s26 = scalar_lea.hbm %s1286_s2, 8192 }
 0x1ab   : > { %p867_p9 = scmp.ne.s32.totalorder %s1236_s4, %s866_s24  ;;  %p871_p5 = scmp.lt.u32.totalorder %s1236_s4, %s1286_s2 }
 0x1ac   : > { %p872_p11 = scmp.lt.u32.totalorder %s870_s26, %s866_s24  ;;  %p874_p4 = scmp.lt.u32.totalorder %s866_s24, %s1236_s4 }
 0x1ad   : > { %p868_p2 = pnand %p867_p9, %p1040_p12 }
 0x1ae   : > { %p873_p1 = por %p872_p11, %p871_p5 }
 0x1af   : > { %p869_p0 = pneg %p868_p2 }
 0x1b0   : > { %p875_p6 = por %p874_p4, %p873_p1 }
 0x1b2   : > { %p876_p8 = pnand %p875_p6, %p869_p0 }
 0x1b4   : > { %879 = shalt.err (!%p876_p8)
}
 0x1b5   : > { %s932_s3 = smov 128   ;;  %s933_s15 = smov 8  }
 0x1b6   : > { %736 = dma.vmem_to_hbm [thread:$0]  (%p1040_p12), %s1238_s22, 4096, %s1236_s4, %s534_s13, %s932_s3, %s932_s3, %s933_s15  }
 0x1b7 PF: > { %s562_s17 = sand.u32 1, %s910_s9   ;;  %p1301_p10 = scmp.ne.s32.totalorder %s1291_s16, 0 }
 0x1b8   : > { %p1302_p13 = scmp.ge.s32.totalorder %s922_s12, 2  ;;  %s563_s27 = scalar_lea.sflag [#allocation4], %s562_s17 }
 0x1ba   : > { %p747_p3 = pnand %p1302_p13, %p1301_p10 }
 0x1bc   : > { %905 = dma.done.wait (!%p747_p3), %s563_s27, 4096  }
 0x1bd   : > { %907 = vsyncadd (!%p747_p3), %s563_s27, 4294963200  ;;  %p16_p7 = scmp.ge.s32.totalorder %s1005_s21, 4   ;;  %s1303_s9 = smov %s914_s10 }
 0x1be   : > { %s1304_s10 = smov %s918_s11  ;;  %s1305_s11 = smov %s1036_s8 }
 0x1bf   : > { %s1306_s12 = smov %s1005_s21  ;;  %18 = sbr.rel (!%p16_p7) target bundleno = 6 (0x6), region = 77 }
 0x1c6   :  { %568 = vsyncpa [#allocation3], 1 }
 0x1c7   :  { %570 = vsyncpa [#allocation3 + $0x1], 1 }
 0x1c8   :  { %571 = vsyncpa [#allocation6], 1 }
 0x1c9   :  { %572 = vsyncpa [#allocation4], 1 }
 0x1ca   :  { %574 = vsyncpa [#allocation4 + $0x1], 1 }

</bundles_post_ra>
